<compile_context>
chip_gen: v6e
topology: v6e:2x2x1
jax: 0.10.0
libtpu: 0.0.40
codegen_flags: <defaults>
</compile_context>

<pallas_src>
import functools

import jax
import jax.numpy as jnp
from jax import lax
from jax.experimental import pallas as pl
from jax.experimental.pallas import tpu as pltpu


def _round_up(x, m):
    return ((x + m - 1) // m) * m


def _vmem_capacity_bytes():
    """Physical VMEM of the local TPU; conservative 64 MiB if unknown."""
    try:
        cap = getattr(pltpu.get_tpu_info(), "vmem_capacity_bytes", None)
        if cap:
            return int(cap)
    except Exception:
        pass
    return 64 * 1024 * 1024


# ---------------------------------------------------------------------------
# Kernel bodies
# ---------------------------------------------------------------------------
def _gate_block(x_rows, w_panel, b_panel, x_cols, out_dtype):
    """gate = sigmoid(x_rows @ w_panel^T + b); returns gate * x_cols."""
    # MXU matmul: contract x dim 1 against weight dim 1 (PyTorch (out, in)
    # layout -> x @ W^T with no wrapper-side transpose). Operands are fed in
    # the weight's dtype (bf16 fast path when inputs were f32), f32 accum.
    logits = lax.dot_general(
        x_rows.astype(w_panel.dtype), w_panel,
        dimension_numbers=(((1,), (1,)), ((), ())),
        preferred_element_type=jnp.float32,
    )
    gate = jax.nn.sigmoid(logits + b_panel.astype(jnp.float32))        # EUP
    if jnp.dtype(out_dtype) == jnp.float32:
        y = gate * x_cols.astype(jnp.float32)
    else:                            # bf16 epilogue: half the VPU/store bytes
        y = gate.astype(out_dtype) * x_cols.astype(out_dtype)
    return y.astype(out_dtype)


def _resident_kernel(x_ref, w_ref, b_ref, o_ref):
    """Weight fully resident in VMEM; one row tile per grid step."""
    x = x_ref[...]
    o_ref[...] = _gate_block(x, w_ref[...], b_ref[...], x, o_ref.dtype)


def _tiled_kernel(x_ref, xc_ref, w_ref, b_ref, o_ref):
    """N-tiled weight panel: full x rows for the matmul + matching x columns."""
    o_ref[...] = _gate_block(x_ref[...], w_ref[...], b_ref[...], xc_ref[...],
                             o_ref.dtype)


# ---------------------------------------------------------------------------
# Wrapper
# ---------------------------------------------------------------------------
@functools.partial(
    jax.jit,
    static_argnames=("tm", "tn", "cast_to_bf16", "single_buffer_weight"))
def _gated_encoding_impl(x, weight, bias, *, tm, tn, cast_to_bf16,
                         single_buffer_weight):
    B, L, H = x.shape
    assert weight.shape == (H, H), weight.shape
    assert bias.shape == (H,), bias.shape
    M = B * L

    # bf16 MXU operands when inputs are f32 (3x+ MXU throughput on v5e/v6e/v7x).
    mm_dtype = jnp.bfloat16 if (cast_to_bf16 and x.dtype == jnp.float32) else x.dtype
    w_mm = weight if weight.dtype == mm_dtype else weight.astype(mm_dtype)
    b2 = bias.reshape(1, H)
    x2 = x.reshape(M, H)

    x_bytes = jnp.dtype(x.dtype).itemsize
    w_bytes = jnp.dtype(mm_dtype).itemsize
    b_bytes = jnp.dtype(bias.dtype).itemsize
    o_bytes = x_bytes

    cap = _vmem_capacity_bytes()
    budget = int(0.60 * cap)          # data-block budget
    vmem_limit = int(0.85 * cap)      # leave compiler-scratch headroom

    # Row tile: as large as VMEM allows; fewer grid steps (~0.35us each) and,
    # on the tiled path, fewer weight re-streams (traffic ~ M*H^2/max(tm,tn)).
    tm = _round_up(max(8, min(tm, _round_up(M, 8))), 8)

    forced_tiled = (tn is not None) and (tn < H)
    w_copies = 1 if single_buffer_weight else 2

    # ---------- Path 1: weight fully resident in VMEM (preferred). ----------
    def resident_bytes(tm_):
        return ((2 * tm_ * H) * (x_bytes + o_bytes)   # x & out (double-buffered)
                + w_copies * H * H * w_bytes          # resident weight
                + w_copies * H * b_bytes)             # resident bias

    tm_res = tm
    while tm_res > 64 and resident_bytes(tm_res) > budget:
        tm_res //= 2

    if (not forced_tiled) and resident_bytes(tm_res) <= budget:
        nm = pl.cdiv(M, tm_res)
        if single_buffer_weight:
            # Whole array staged once into VMEM (single copy, one HBM fetch).
            w_spec = pl.BlockSpec(memory_space=pltpu.MemorySpace.VMEM)
            b_spec = pl.BlockSpec(memory_space=pltpu.MemorySpace.VMEM)
        else:
            # Constant block index -> still fetched once, but double-buffered.
            w_spec = pl.BlockSpec((H, H), lambda i: (0, 0))
            b_spec = pl.BlockSpec((1, H), lambda i: (0, 0))
        cost = pl.CostEstimate(
            flops=2 * M * H * H,
            transcendentals=M * H,
            bytes_accessed=2 * M * H * x_bytes + H * H * w_bytes + H * b_bytes)
        out2 = pl.pallas_call(
            _resident_kernel,
            out_shape=jax.ShapeDtypeStruct((M, H), x.dtype),
            grid_spec=pltpu.PrefetchScalarGridSpec(
                num_scalar_prefetch=0,
                grid=(nm,),
                in_specs=[pl.BlockSpec((tm_res, H), lambda i: (i, 0)),
                          w_spec, b_spec],
                out_specs=pl.BlockSpec((tm_res, H), lambda i: (i, 0))),
            compiler_params=pltpu.CompilerParams(
                dimension_semantics=("parallel",),
                vmem_limit_bytes=vmem_limit),
            cost_estimate=cost,
        )(x2, w_mm, b2)
        return out2.reshape(B, L, H)

    # -------- Path 2: N-tiled weight panels (huge H, or tn forced). ---------
    if tn is None or tn >= H:
        tn = 512 if H > 512 else _round_up(H, 128)
    tn = max(128, _round_up(tn, 128))

    def tiled_bytes(tm_, tn_):
        return (2 * tm_ * H * x_bytes          # x rows (resident across j)
                + 2 * tm_ * tn_ * x_bytes      # x column panel (gating)
                + 2 * tm_ * tn_ * o_bytes      # out panel
                + 2 * tn_ * H * w_bytes        # weight panel (streamed over j)
                + 2 * tn_ * b_bytes)

    tm_t = tm
    while tm_t > 64 and tiled_bytes(tm_t, tn) > budget:
        tm_t //= 2
    while tn > 128 and tiled_bytes(tm_t, tn) > budget:
        tn = max(128, (tn // 2) // 128 * 128)

    nm, nn = pl.cdiv(M, tm_t), pl.cdiv(H, tn)
    cost = pl.CostEstimate(
        flops=2 * M * H * H,
        transcendentals=M * H,
        bytes_accessed=(3 * M * H * x_bytes          # x rows + x cols + out
                        + nm * H * H * w_bytes       # weight re-streamed per row tile
                        + nm * H * b_bytes))
    out2 = pl.pallas_call(
        _tiled_kernel,
        out_shape=jax.ShapeDtypeStruct((M, H), x.dtype),
        grid_spec=pltpu.PrefetchScalarGridSpec(
            num_scalar_prefetch=0,
            grid=(nm, nn),
            in_specs=[
                pl.BlockSpec((tm_t, H), lambda i, j: (i, 0)),   # full rows (matmul)
                pl.BlockSpec((tm_t, tn), lambda i, j: (i, j)),  # matching x columns
                pl.BlockSpec((tn, H), lambda i, j: (j, 0)),     # weight row panel W[j*tn:]
                pl.BlockSpec((1, tn), lambda i, j: (0, j)),     # bias slice
            ],
            out_specs=pl.BlockSpec((tm_t, tn), lambda i, j: (i, j))),
        compiler_params=pltpu.CompilerParams(
            dimension_semantics=("parallel", "parallel"),
            vmem_limit_bytes=vmem_limit),
        cost_estimate=cost,
    )(x2, x2, w_mm, b2)
    return out2.reshape(B, L, H)


_UNBLOCKED_VMEM_WEIGHT_OK = True   # flips off if this jax rejects unblocked VMEM operands


def gated_encoding(x, weight, bias, *, tm=1024, tn=None, cast_to_bf16=True):
    """gated_x = sigmoid(x @ weight^T + bias) * x, for x of shape (B, L, H)."""
    global _UNBLOCKED_VMEM_WEIGHT_OK
    if _UNBLOCKED_VMEM_WEIGHT_OK:
        try:
            return _gated_encoding_impl(x, weight, bias, tm=tm, tn=tn,
                                        cast_to_bf16=cast_to_bf16,
                                        single_buffer_weight=True)
        except Exception:
            _UNBLOCKED_VMEM_WEIGHT_OK = False   # fall back to blocked resident weight
    return _gated_encoding_impl(x, weight, bias, tm=tm, tn=tn,
                                cast_to_bf16=cast_to_bf16,
                                single_buffer_weight=False)


# ---------------------------------------------------------------------------
# Reference + self-test
# ---------------------------------------------------------------------------
def _reference(x, weight, bias, mm_dtype):
    B, L, H = x.shape
    x2 = x.reshape(-1, H)
    logits = lax.dot_general(
        x2.astype(mm_dtype), weight.astype(mm_dtype),
        dimension_numbers=(((1,), (1,)), ((), ())),
        preferred_element_type=jnp.float32)
    gate = jax.nn.sigmoid(logits + bias.astype(jnp.float32).reshape(1, H))
    return (gate * x2.astype(jnp.float32)).astype(x.dtype).reshape(B, L, H)


if __name__ == "__main__":
    keys = jax.random.split(jax.random.PRNGKey(0), 9)

    def make(kx, kw, kb, B, L, H):
        bound = 1.0 / (H ** 0.5)
        x = jax.random.normal(kx, (B, L, H), dtype=jnp.float32)
        w = jax.random.uniform(kw, (H, H), jnp.float32, minval=-bound, maxval=bound)
        b = jax.random.uniform(kb, (H,), jnp.float32, minval=-bound, maxval=bound)
        return x, w, b

    # 1) Small spec-sized check (batch=2, len=8, hdim=32): resident-weight path.
    x, w, b = make(keys[0], keys[1], keys[2], 2, 8, 32)
    out = jax.block_until_ready(gated_encoding(x, w, b))
    ref = _reference(x, w, b, jnp.bfloat16)
    assert out.shape == x.shape
    assert jnp.allclose(out, ref, atol=1e-3, rtol=1e-3), "mismatch (small, resident)"

    # 2) Larger hidden dim: resident weight + large row tile + bf16 MXU operands.
    x, w, b = make(keys[3], keys[4], keys[5], 2, 128, 2048)
    out = jax.block_until_ready(gated_encoding(x, w, b))
    ref = _reference(x, w, b, jnp.bfloat16)
    assert jnp.allclose(out, ref, atol=1e-3, rtol=1e-3), "mismatch (large, resident)"

    # 3) Forced N-tiled path with ragged row/column blocks (M=200, H=320, tn=128).
    x, w, b = make(keys[6], keys[7], keys[8], 2, 100, 320)
    out = jax.block_until_ready(gated_encoding(x, w, b, tm=64, tn=128))
    ref = _reference(x, w, b, jnp.bfloat16)
    assert jnp.allclose(out, ref, atol=1e-3, rtol=1e-3), "mismatch (tiled, ragged)"

    print("KERNEL_OK")
</pallas_src>

<mosaic_0001>
module attributes {stable_mosaic.version = 11 : i64} {
  func.func @_resident_kernel(%arg0: i32, %arg1: memref<16x32xf32, #tpu.memory_space<vmem>>, %arg2: memref<32x32xbf16, #tpu.memory_space<vmem>>, %arg3: memref<1x32xf32, #tpu.memory_space<vmem>>, %arg4: memref<16x32xf32, #tpu.memory_space<vmem>>) attributes {dimension_semantics = [#tpu.dimension_semantics<parallel>], iteration_bounds = array<i64: 1>, scalar_prefetch = 0 : i64, scratch_operands = 0 : i64, tpu.core_type = #tpu.core_type<tc>, window_params = [{transform_indices = @transform_0, window_bounds = array<i64: 16, 32>}, {pipeline_mode = #tpu.pipeline_mode<synchronous>, transform_indices = @transform_1, window_bounds = array<i64: 32, 32>}, {pipeline_mode = #tpu.pipeline_mode<synchronous>, transform_indices = @transform_2, window_bounds = array<i64: 1, 32>}, {transform_indices = @transform_3, window_bounds = array<i64: 16, 32>}]} {
    %c0 = arith.constant 0 : index
    %c0_0 = arith.constant 0 : index
    %0 = vector.load %arg1[%c0, %c0_0] : memref<16x32xf32, #tpu.memory_space<vmem>>, vector<16x32xf32>
    %c0_1 = arith.constant 0 : index
    %c0_2 = arith.constant 0 : index
    %1 = vector.load %arg2[%c0_1, %c0_2] : memref<32x32xbf16, #tpu.memory_space<vmem>>, vector<32x32xbf16>
    %c0_3 = arith.constant 0 : index
    %c0_4 = arith.constant 0 : index
    %2 = vector.load %arg3[%c0_3, %c0_4] : memref<1x32xf32, #tpu.memory_space<vmem>>, vector<1x32xf32>
    %3 = arith.truncf %0 : vector<16x32xf32> to vector<16x32xbf16>
    %cst = arith.constant dense<0.000000e+00> : vector<16x32xf32>
    %4 = tpu.matmul %3, %1, %cst {dimension_numbers = #tpu.dot_dimension_numbers<[1], [1], [0], [0], [0, 0, 1, 0], [], []>} : vector<16x32xbf16>, vector<32x32xbf16>, vector<16x32xf32> -> vector<16x32xf32>
    %5 = vector.broadcast %2 : vector<1x32xf32> to vector<16x32xf32>
    %6 = arith.addf %4, %5 : vector<16x32xf32>
    %7 = arith.negf %6 : vector<16x32xf32>
    %8 = math.exp %7 : vector<16x32xf32>
    %cst_5 = arith.constant 1.000000e+00 : f32
    %9 = vector.broadcast %cst_5 : f32 to vector<16x32xf32>
    %10 = arith.addf %9, %8 : vector<16x32xf32>
    %11 = arith.divf %9, %10 : vector<16x32xf32>
    %12 = arith.mulf %11, %0 : vector<16x32xf32>
    %c0_6 = arith.constant 0 : index
    %c0_7 = arith.constant 0 : index
    %13 = vector.load %arg4[%c0_6, %c0_7] : memref<16x32xf32, #tpu.memory_space<vmem>>, vector<16x32xf32>
    tpu.vector_store %arg4[%c0_6, %c0_7], %12 {strides = array<i32>} : memref<16x32xf32, #tpu.memory_space<vmem>>, vector<16x32xf32>,
    return
  }
  func.func @transform_0(%arg0: i32) -> (i32, i32) {
    %c0_i32 = arith.constant 0 : i32
    %c0_i32_0 = arith.constant 0 : i32
    return %arg0, %c0_i32 : i32, i32
  }
  func.func @transform_1(%arg0: i32) -> (i32, i32) {
    %c0_i32 = arith.constant 0 : i32
    %c0_i32_0 = arith.constant 0 : i32
    %c0_i32_1 = arith.constant 0 : i32
    return %c0_i32, %c0_i32_0 : i32, i32
  }
  func.func @transform_2(%arg0: i32) -> (i32, i32) {
    %c0_i32 = arith.constant 0 : i32
    %c0_i32_0 = arith.constant 0 : i32
    %c0_i32_1 = arith.constant 0 : i32
    return %c0_i32, %c0_i32_0 : i32, i32
  }
  func.func @transform_3(%arg0: i32) -> (i32, i32) {
    %c0_i32 = arith.constant 0 : i32
    %c0_i32_0 = arith.constant 0 : i32
    return %arg0, %c0_i32 : i32, i32
  }
}

module attributes {stable_mosaic.version = 11 : i64} {
  func.func @_resident_kernel(%arg0: i32, %arg1: memref<16x32xf32, #tpu.memory_space<vmem>>, %arg2: memref<32x32xbf16, #tpu.memory_space<vmem>>, %arg3: memref<1x32xf32, #tpu.memory_space<vmem>>, %arg4: memref<16x32xf32, #tpu.memory_space<vmem>>) attributes {dimension_semantics = [#tpu.dimension_semantics<parallel>], iteration_bounds = array<i64: 1>, scalar_prefetch = 0 : i64, scratch_operands = 0 : i64, tpu.core_type = #tpu.core_type<tc>, window_params = [{transform_indices = @transform_0, window_bounds = array<i64: 16, 32>}, {pipeline_mode = #tpu.pipeline_mode<synchronous>, transform_indices = @transform_1, window_bounds = array<i64: 32, 32>}, {pipeline_mode = #tpu.pipeline_mode<synchronous>, transform_indices = @transform_2, window_bounds = array<i64: 1, 32>}, {transform_indices = @transform_3, window_bounds = array<i64: 16, 32>}]} {
    %c0 = arith.constant 0 : index
    %c0_0 = arith.constant 0 : index
    %0 = vector.load %arg1[%c0, %c0_0] : memref<16x32xf32, #tpu.memory_space<vmem>>, vector<16x32xf32>
    %c0_1 = arith.constant 0 : index
    %c0_2 = arith.constant 0 : index
    %1 = vector.load %arg2[%c0_1, %c0_2] : memref<32x32xbf16, #tpu.memory_space<vmem>>, vector<32x32xbf16>
    %c0_3 = arith.constant 0 : index
    %c0_4 = arith.constant 0 : index
    %2 = vector.load %arg3[%c0_3, %c0_4] : memref<1x32xf32, #tpu.memory_space<vmem>>, vector<1x32xf32>
    %3 = arith.truncf %0 : vector<16x32xf32> to vector<16x32xbf16>
    %cst = arith.constant dense<0.000000e+00> : vector<16x32xf32>
    %4 = tpu.matmul %3, %1, %cst {dimension_numbers = #tpu.dot_dimension_numbers<[1], [1], [0], [0], [0, 0, 1, 0], [], []>} : vector<16x32xbf16>, vector<32x32xbf16>, vector<16x32xf32> -> vector<16x32xf32>
    %5 = vector.broadcast %2 : vector<1x32xf32> to vector<16x32xf32>
    %6 = arith.addf %4, %5 : vector<16x32xf32>
    %7 = arith.negf %6 : vector<16x32xf32>
    %8 = math.exp %7 : vector<16x32xf32>
    %cst_5 = arith.constant 1.000000e+00 : f32
    %9 = vector.broadcast %cst_5 : f32 to vector<16x32xf32>
    %10 = arith.addf %9, %8 : vector<16x32xf32>
    %11 = arith.divf %9, %10 : vector<16x32xf32>
    %12 = arith.mulf %11, %0 : vector<16x32xf32>
    %c0_6 = arith.constant 0 : index
    %c0_7 = arith.constant 0 : index
    %13 = vector.load %arg4[%c0_6, %c0_7] : memref<16x32xf32, #tpu.memory_space<vmem>>, vector<16x32xf32>
    tpu.vector_store %arg4[%c0_6, %c0_7], %12 {strides = array<i32>} : memref<16x32xf32, #tpu.memory_space<vmem>>, vector<16x32xf32>,
    return
  }
  func.func @transform_0(%arg0: i32) -> (i32, i32) {
    %c0_i32 = arith.constant 0 : i32
    %c0_i32_0 = arith.constant 0 : i32
    return %arg0, %c0_i32 : i32, i32
  }
  func.func @transform_1(%arg0: i32) -> (i32, i32) {
    %c0_i32 = arith.constant 0 : i32
    %c0_i32_0 = arith.constant 0 : i32
    %c0_i32_1 = arith.constant 0 : i32
    return %c0_i32, %c0_i32_0 : i32, i32
  }
  func.func @transform_2(%arg0: i32) -> (i32, i32) {
    %c0_i32 = arith.constant 0 : i32
    %c0_i32_0 = arith.constant 0 : i32
    %c0_i32_1 = arith.constant 0 : i32
    return %c0_i32, %c0_i32_0 : i32, i32
  }
  func.func @transform_3(%arg0: i32) -> (i32, i32) {
    %c0_i32 = arith.constant 0 : i32
    %c0_i32_0 = arith.constant 0 : i32
    return %arg0, %c0_i32 : i32, i32
  }
}

</mosaic_0001>

<bundles_post_ra>
// kernel: _gated_encoding_impl.1
= control target key start
LH: loop header
LB: loop body
LE: loop exit
PB: predicated region body
PF: predicated region fallthrough
CT: control target
= control target key end

     0   :  { %v177_v1 = vmov 0.0   ;;  %vm40_vm0 = vcmask 261120   ;;  %vm178_vm1 = vmmov 0   ;;  %s225_s0 = inlined_call_operand.vmem [shape: f32[16,32], index: 0, kind: input, shape index: {}]   ;;  %s226_s1 = inlined_call_operand.vmem [shape: bf16[32,32], index: 1, kind: input, shape index: {}]   ;;  %s227_s2 = inlined_call_operand.vmem [shape: f32[1,32], index: 2, kind: input, shape index: {}]   ;;  %s228_s3 = inlined_call_operand.hbm [shape: f32[16,32], index: 3, kind: output, shape index: {}]  }
   0x1   :  { %v145_v0 = vld [vmem:[%s226_s1 + $0x8] sm:$0xff]   ;;  %132 = vmatprep.subr.bf16.mxu0 %v177_v1  ;;  %136 = vmatprep.mubr.msk.bf16.mxu0 %vm178_vm1, %v177_v1 }
   0x2   :  { %v48_v2 = vsel %vm40_vm0, %v145_v0, 0 }
   0x3   :  { %133 = vmatpush3.bf16.xpose.msra.mxu0 %v48_v2 }
   0x4   :  { %8 = vsyncpa [#allocation3], 0  ;;  %134 = vmatprep.subr.bf16.mxu0 %v177_v1  ;;  %v146_v3 = vld [vmem:[%s226_s1] sm:$0xff]   ;;  %v17_v6 = vld [vmem:[%s225_s0 + $0x8] sm:$0xff] }
   0x5   :  { %v45_v4 = vsel %vm40_vm0, %v146_v3, 0  ;;  %v16_v5 = vld [vmem:[%s225_s0] sm:$0xff]  ;;  %s179_s0 = smov [#allocation2]  }
   0x6   :  { %v23_v7 = vpack.c.bf16 %v17_v6, %v16_v5  ;;  %v123_v8 = vld [vmem:[%s227_s2] ss:$0 sm:$0xff]  ;;  %s112_s1 = sshll.u32 %s179_s0, 4  ;;  %s113_s1 = int_to_ptr.vmem [resolvable:$true] %s112_s1 }
   0x7   :  { %s155_s2 = scalar_lea.vmem %s113_s1, 256  ;;  %p160_p1 = scmp.lt.s32.totalorder %s113_s1, %s113_s1 }
   0x8   :  { %p156_p0 = scmp.ne.s32.totalorder %s113_s1, %s155_s2  ;;  %p161_p2 = scmp.lt.s32.totalorder %s155_s2, %s155_s2 }
   0xa   :  { %p162_p3 = por %p161_p2, %p160_p1 }
   0xb   :  { %135 = vmatpush3.bf16.xpose.msra.mxu0 %v45_v4 }
   0xc   :  { %p163_p4 = pnand %p162_p3, %p156_p0 }
  0x12   :  { %137 = vmatmul.mubr.msk.bf16.vlgmr.msra.gmra.mxu0 %vm40_vm0, %v23_v7 }
  0xd2   :  { %v84_v9 = vpop.f32.mrf.mxu0 }
  0xd3   :  { %v85_v10 = vadd.f32 %v123_v8, %v84_v9 }
  0xd4   :  { %v138_v11 = vpop.f32.mrf.mxu0 }
  0xd5   :  { %v127_v12 = vmul.f32 -1.442695, %v85_v10 }
  0xd6   :  { %v87_v13 = vpop.f32.mrf.mxu0 }
  0xd7   :  { %147 = vpow2.f32 %v127_v12  ;;  %v88_v14 = vadd.f32 %v123_v8, %v87_v13 }
  0xd8   :  { %v139_v15 = vpop.f32.mrf.mxu0 }
  0xd9   :  { %v128_v16 = vmul.f32 -1.442695, %v88_v14 }
  0xdb   :  { %149 = vpow2.f32 %v128_v16 }
  0xe4   :  { %v148_v17 = vpop.eup %147 }
  0xe5   :  { %v97_v18 = vadd.f32 1.0, %v148_v17 }
  0xe7   :  { %151 = vrcp.f32 %v97_v18 }
  0xe8   :  { %v150_v19 = vpop.eup %149 }
  0xe9   :  { %v98_v20 = vadd.f32 1.0, %v150_v19 }
  0xeb   :  { %153 = vrcp.f32 %v98_v20 }
  0xf4   :  { %v152_v21 = vpop.eup %151 }
  0xf5   :  { %v103_v22 = vmul.f32 %v152_v21, %v16_v5 }
  0xf7   :  { %105 = vst.msk [vmem:[#allocation2] sm:$0xff] %vm40_vm0, %v103_v22 }
  0xf8   :  { %v154_v23 = vpop.eup %153 }
  0xf9   :  { %v104_v24 = vmul.f32 %v154_v23, %v17_v6 }
  0xfb   :  { %106 = vst.msk [vmem:[#allocation2 + $0x8] sm:$0xff] %vm40_vm0, %v104_v24 }
  0xfc   :  { %166 = shalt.err (!%p163_p4)
}
  0xfd   :  { %s180_s22 = smov 128   ;;  %s181_s23 = smov 8  }
  0xfe   :  { %118 = dma.vmem_to_hbm [thread:$0]  %s113_s1, 256, %s228_s3, [#allocation3], %s180_s22, %s180_s22, %s181_s23  }
  0xff   :  { %175 = dma.done.wait [#allocation3], 256  }
 0x100   :  { %176 = vsyncadd [#allocation3], 4294967040 }
 0x101   :  { %122 = vsyncpa [#allocation3], 1 }

// kernel: _gated_encoding_impl.1
= control target key start
LH: loop header
LB: loop body
LE: loop exit
PB: predicated region body
PF: predicated region fallthrough
CT: control target
= control target key end

     0   :  { %v177_v1 = vmov 0.0   ;;  %vm40_vm0 = vcmask 261120   ;;  %vm178_vm1 = vmmov 0   ;;  %s225_s0 = inlined_call_operand.vmem [shape: f32[16,32], index: 0, kind: input, shape index: {}]   ;;  %s226_s1 = inlined_call_operand.vmem [shape: bf16[32,32], index: 1, kind: input, shape index: {}]   ;;  %s227_s2 = inlined_call_operand.vmem [shape: f32[1,32], index: 2, kind: input, shape index: {}]   ;;  %s228_s3 = inlined_call_operand.hbm [shape: f32[16,32], index: 3, kind: output, shape index: {}]  }
   0x1   :  { %v145_v0 = vld [vmem:[%s226_s1 + $0x8] sm:$0xff]   ;;  %132 = vmatprep.subr.bf16.mxu0 %v177_v1  ;;  %136 = vmatprep.mubr.msk.bf16.mxu0 %vm178_vm1, %v177_v1 }
   0x2   :  { %v48_v2 = vsel %vm40_vm0, %v145_v0, 0 }
   0x3   :  { %133 = vmatpush3.bf16.xpose.msra.mxu0 %v48_v2 }
   0x4   :  { %8 = vsyncpa [#allocation3], 0  ;;  %134 = vmatprep.subr.bf16.mxu0 %v177_v1  ;;  %v146_v3 = vld [vmem:[%s226_s1] sm:$0xff]   ;;  %v17_v6 = vld [vmem:[%s225_s0 + $0x8] sm:$0xff] }
   0x5   :  { %v45_v4 = vsel %vm40_vm0, %v146_v3, 0  ;;  %v16_v5 = vld [vmem:[%s225_s0] sm:$0xff]  ;;  %s179_s0 = smov [#allocation2]  }
   0x6   :  { %v23_v7 = vpack.c.bf16 %v17_v6, %v16_v5  ;;  %v123_v8 = vld [vmem:[%s227_s2] ss:$0 sm:$0xff]  ;;  %s112_s1 = sshll.u32 %s179_s0, 4  ;;  %s113_s1 = int_to_ptr.vmem [resolvable:$true] %s112_s1 }
   0x7   :  { %s155_s2 = scalar_lea.vmem %s113_s1, 256  ;;  %p160_p1 = scmp.lt.s32.totalorder %s113_s1, %s113_s1 }
   0x8   :  { %p156_p0 = scmp.ne.s32.totalorder %s113_s1, %s155_s2  ;;  %p161_p2 = scmp.lt.s32.totalorder %s155_s2, %s155_s2 }
   0xa   :  { %p162_p3 = por %p161_p2, %p160_p1 }
   0xb   :  { %135 = vmatpush3.bf16.xpose.msra.mxu0 %v45_v4 }
   0xc   :  { %p163_p4 = pnand %p162_p3, %p156_p0 }
  0x12   :  { %137 = vmatmul.mubr.msk.bf16.vlgmr.msra.gmra.mxu0 %vm40_vm0, %v23_v7 }
  0xd2   :  { %v84_v9 = vpop.f32.mrf.mxu0 }
  0xd3   :  { %v85_v10 = vadd.f32 %v123_v8, %v84_v9 }
  0xd4   :  { %v138_v11 = vpop.f32.mrf.mxu0 }
  0xd5   :  { %v127_v12 = vmul.f32 -1.442695, %v85_v10 }
  0xd6   :  { %v87_v13 = vpop.f32.mrf.mxu0 }
  0xd7   :  { %147 = vpow2.f32 %v127_v12  ;;  %v88_v14 = vadd.f32 %v123_v8, %v87_v13 }
  0xd8   :  { %v139_v15 = vpop.f32.mrf.mxu0 }
  0xd9   :  { %v128_v16 = vmul.f32 -1.442695, %v88_v14 }
  0xdb   :  { %149 = vpow2.f32 %v128_v16 }
  0xe4   :  { %v148_v17 = vpop.eup %147 }
  0xe5   :  { %v97_v18 = vadd.f32 1.0, %v148_v17 }
  0xe7   :  { %151 = vrcp.f32 %v97_v18 }
  0xe8   :  { %v150_v19 = vpop.eup %149 }
  0xe9   :  { %v98_v20 = vadd.f32 1.0, %v150_v19 }
  0xeb   :  { %153 = vrcp.f32 %v98_v20 }
  0xf4   :  { %v152_v21 = vpop.eup %151 }
  0xf5   :  { %v103_v22 = vmul.f32 %v152_v21, %v16_v5 }
  0xf7   :  { %105 = vst.msk [vmem:[#allocation2] sm:$0xff] %vm40_vm0, %v103_v22 }
  0xf8   :  { %v154_v23 = vpop.eup %153 }
  0xf9   :  { %v104_v24 = vmul.f32 %v154_v23, %v17_v6 }
  0xfb   :  { %106 = vst.msk [vmem:[#allocation2 + $0x8] sm:$0xff] %vm40_vm0, %v104_v24 }
  0xfc   :  { %166 = shalt.err (!%p163_p4)
}
  0xfd   :  { %s180_s22 = smov 128   ;;  %s181_s23 = smov 8  }
  0xfe   :  { %118 = dma.vmem_to_hbm [thread:$0]  %s113_s1, 256, %s228_s3, [#allocation3], %s180_s22, %s180_s22, %s181_s23  }
  0xff   :  { %175 = dma.done.wait [#allocation3], 256  }
 0x100   :  { %176 = vsyncadd [#allocation3], 4294967040 }
 0x101   :  { %122 = vsyncpa [#allocation3], 1 }

</bundles_post_ra>
